<compile_context>
chip_gen: v5e
topology: v5e:2x2
jax: 0.10.0
libtpu: 0.0.40
codegen_flags: <defaults>
</compile_context>

<pallas_src>
import functools
import math

import jax
import jax.numpy as jnp
from jax import lax
from jax.experimental import pallas as pl
from jax.experimental.pallas import tpu as pltpu


def _round_up(x, m):
    return (x + m - 1) // m * m


# ----------------------------------------------------------------------------
# Path A: table resident in VMEM, gather via vocab-chunked one-hot MXU matmul.
# ----------------------------------------------------------------------------
def _resident_gather_kernel(ids_ref, table_ref, out_ref, *, scale, vocab_size,
                            vocab_chunk):
    # ids_ref:   VMEM (T, 1) int32   -- token ids for this block
    # table_ref: VMEM (V, D)         -- full embedding table (single resident copy)
    # out_ref:   VMEM (T, D)         -- scaled embeddings
    ids = ids_ref[...]                                    # (T, 1)
    t_tokens, d_model = out_ref.shape
    acc = jnp.zeros((t_tokens, d_model), jnp.float32)
    # Chunk the one-hot over the vocab so we never hold a (T, V) intermediate.
    for c0 in range(0, vocab_size, vocab_chunk):
        sz = min(vocab_chunk, vocab_size - c0)
        iota = lax.broadcasted_iota(jnp.int32, (t_tokens, sz), 1) + c0
        one_hot = (iota == ids).astype(table_ref.dtype)   # (T, sz), table dtype
        acc = acc + jnp.dot(one_hot, table_ref[pl.ds(c0, sz), :],
                            preferred_element_type=jnp.float32)
    out_ref[...] = (acc * scale).astype(out_ref.dtype)


# ----------------------------------------------------------------------------
# Path B: table in HBM, double-buffered per-row DMA gather.
# ----------------------------------------------------------------------------
def _dma_gather_kernel(ids_ref, table_hbm, out_ref, rows, sems, *,
                       scale, block_tokens):
    # ids_ref:   SMEM (N_pad,) int32  (scalar prefetch)
    # table_hbm: HBM  (V, D)          (memory_space=pl.ANY, manual DMA)
    # out_ref:   VMEM (T, D)
    # rows:      VMEM (2, T, D)       double-buffered row-gather landing buffer
    # sems:      DMA semaphores, shape (2,) -- one per buffer slot
    i = pl.program_id(0)
    nblocks = pl.num_programs(0)
    slot = i % 2
    next_slot = 1 - slot

    def issue(block_start, slot_idx):
        # Fully unrolled (T is compile-time static): all T row descriptors are
        # issued back to back; they all signal the same per-slot semaphore.
        for t in range(block_tokens):
            tok = ids_ref[block_start + t]
            pltpu.make_async_copy(table_hbm.at[tok], rows.at[slot_idx, t],
                                  sems.at[slot_idx]).start()

    # Prime the pipeline: on the very first step fetch this block's rows.
    @pl.when(i == 0)
    def _():
        issue(0, 0)

    # Prefetch the NEXT block's rows into the other slot before blocking on this
    # block's gather -> DMA latency overlaps compute + pipelined output writeback.
    @pl.when(i + 1 < nblocks)
    def _():
        issue((i + 1) * block_tokens, next_slot)

    # One aggregate wait for all T row copies of this block.  The descriptor is
    # never started: it only defines the byte count (T * D * itemsize) which
    # equals the sum signalled by the T per-row copies on sems[slot].
    pltpu.make_async_copy(rows.at[0], rows.at[1], sems.at[slot]).wait()

    out_ref[...] = (rows[slot].astype(jnp.float32) * scale).astype(out_ref.dtype)


# ----------------------------------------------------------------------------
# Wrapper.
# ----------------------------------------------------------------------------
def token_embedding(ids, emb_table, *, block_tokens=256,
                    resident_table_bytes_limit=4 * 1024 * 1024,
                    resident_vocab_limit=2048,
                    vmem_rows_budget_bytes=8 * 1024 * 1024,
                    force_path=None):
    """ids: [B, S] integer token indices; emb_table: [V, D].

    Returns [B, S, D] = emb_table[ids] * sqrt(D).
    """
    B, S = ids.shape
    V, D = emb_table.shape
    dtype = emb_table.dtype
    itemsize = jnp.dtype(dtype).itemsize
    scale = math.sqrt(D)

    N = B * S
    # Tokens per grid step: multiple of 8 (sublane-aligned (T, D) tiles), capped so
    # 2x rows scratch + 2x out buffers stay well inside the default scoped-VMEM
    # budget on every TPU generation (incl. v7x's smaller VMEM).
    per_token_bytes = 4 * D * itemsize
    T = min(block_tokens, _round_up(N, 8),
            max(8, vmem_rows_budget_bytes // per_token_bytes))
    T = max(8, (T // 8) * 8)
    N_pad = _round_up(N, T)
    num_blocks = N_pad // T

    # NOTE: out-of-range ids are clamped to [0, V) (nn.Embedding would error);
    # padding tokens map to row 0 and are sliced off below.
    flat_ids = jnp.clip(ids.reshape(-1).astype(jnp.int32), 0, V - 1)
    flat_ids = jnp.pad(flat_ids, (0, N_pad - N))

    table_bytes = V * D * itemsize
    use_resident = (table_bytes <= resident_table_bytes_limit
                    and V <= resident_vocab_limit)
    if force_path == "resident":
        use_resident = True
    elif force_path == "dma":
        use_resident = False

    if use_resident:
        vocab_chunk = min(V, 512)
        cost = pl.CostEstimate(
            flops=2 * N_pad * V * D,
            transcendentals=0,
            bytes_accessed=table_bytes + N_pad * 4 + N_pad * D * itemsize,
        )
        out_flat = pl.pallas_call(
            functools.partial(_resident_gather_kernel, scale=scale,
                              vocab_size=V, vocab_chunk=vocab_chunk),
            out_shape=jax.ShapeDtypeStruct((N_pad, D), dtype),
            grid=(num_blocks,),
            in_specs=[
                pl.BlockSpec((T, 1), lambda i: (i, 0)),            # ids block
                # Whole table resident in VMEM for the entire call: one copy,
                # no per-step double-buffering of the table.
                pl.BlockSpec(memory_space=pltpu.MemorySpace.VMEM),
            ],
            out_specs=pl.BlockSpec((T, D), lambda i: (i, 0)),
            compiler_params=pltpu.CompilerParams(
                dimension_semantics=("parallel",),
            ),
            cost_estimate=cost,
        )(flat_ids.reshape(N_pad, 1), emb_table)
    else:
        cost = pl.CostEstimate(
            flops=N_pad * D,
            transcendentals=0,
            bytes_accessed=N_pad * 4 + 2 * N_pad * D * itemsize,
        )
        out_flat = pl.pallas_call(
            functools.partial(_dma_gather_kernel, scale=scale, block_tokens=T),
            out_shape=jax.ShapeDtypeStruct((N_pad, D), dtype),
            grid_spec=pltpu.PrefetchScalarGridSpec(
                num_scalar_prefetch=1,
                grid=(num_blocks,),
                in_specs=[
                    pl.BlockSpec(memory_space=pl.ANY),   # table stays in HBM
                ],
                out_specs=pl.BlockSpec((T, D), lambda i, ids: (i, 0)),
                scratch_shapes=[
                    pltpu.VMEM((2, T, D), dtype),        # double-buffered rows
                    pltpu.SemaphoreType.DMA((2,)),       # one sem per slot
                ],
            ),
            compiler_params=pltpu.CompilerParams(
                # Cross-step double buffering carries state between grid steps,
                # so the grid axis must run sequentially on one core.
                dimension_semantics=("arbitrary",),
            ),
            cost_estimate=cost,
        )(flat_ids, emb_table)

    return out_flat[:N].reshape(B, S, D)


def init_embedding_table(key, vocab_size, d_model):
    """Deterministic xavier_uniform init, matching nn.init.xavier_uniform_."""
    bound = math.sqrt(6.0 / (vocab_size + d_model))
    return jax.random.uniform(key, (vocab_size, d_model), dtype=jnp.float32,
                              minval=-bound, maxval=bound)


if __name__ == "__main__":
    vocab_size = 64
    d_model = 128          # lane-dense output (multiple of 128)
    batch = 2
    seq = 8

    key = jax.random.PRNGKey(0)
    k_emb, k_ids = jax.random.split(key)

    emb_table = init_embedding_table(k_emb, vocab_size, d_model)
    ids = jax.random.randint(k_ids, (batch, seq), 0, vocab_size, dtype=jnp.int32)

    ref = emb_table[ids] * math.sqrt(d_model)

    # Path A: small table -> resident-in-VMEM chunked one-hot MXU gather.
    out_resident = jax.block_until_ready(token_embedding(ids, emb_table))
    assert out_resident.shape == (batch, seq, d_model)
    assert out_resident.dtype == jnp.float32
    assert jnp.allclose(out_resident, ref, atol=1e-5, rtol=1e-5)

    # Path B: force the HBM DMA-gather path (single block).
    out_dma = jax.block_until_ready(
        token_embedding(ids, emb_table, force_path="dma"))
    assert jnp.allclose(out_dma, ref, atol=1e-5, rtol=1e-5)

    # Path B with multiple grid steps -> exercises the double-buffered prefetch.
    out_dma_mb = jax.block_until_ready(
        token_embedding(ids, emb_table, force_path="dma", block_tokens=8))
    assert jnp.allclose(out_dma_mb, ref, atol=1e-5, rtol=1e-5)

    print("KERNEL_OK")
</pallas_src>

<mosaic_0001>
module attributes {stable_mosaic.version = 11 : i64} {
  func.func @_resident_gather_kernel(%arg0: i32, %arg1: memref<16x1xi32, #tpu.memory_space<vmem>>, %arg2: memref<64x128xf32, #tpu.memory_space<vmem>>, %arg3: memref<16x128xf32, #tpu.memory_space<vmem>>) attributes {dimension_semantics = [#tpu.dimension_semantics<parallel>], iteration_bounds = array<i64: 1>, scalar_prefetch = 0 : i64, scratch_operands = 0 : i64, tpu.core_type = #tpu.core_type<tc>, window_params = [{transform_indices = @transform_0, window_bounds = array<i64: 16, 1>}, {pipeline_mode = #tpu.pipeline_mode<synchronous>, transform_indices = @transform_1, window_bounds = array<i64: 64, 128>}, {transform_indices = @transform_2, window_bounds = array<i64: 16, 128>}]} {
    %c0 = arith.constant 0 : index
    %c0_0 = arith.constant 0 : index
    %0 = vector.load %arg1[%c0, %c0_0] : memref<16x1xi32, #tpu.memory_space<vmem>>, vector<16x1xi32>
    %cst = arith.constant 0.000000e+00 : f32
    %1 = vector.broadcast %cst : f32 to vector<16x128xf32>
    %2 = tpu.iota {dimensions = array<i32: 1>} : vector<16x64xi32>
    %c0_i32 = arith.constant 0 : i32
    %3 = vector.broadcast %c0_i32 : i32 to vector<16x64xi32>
    %4 = arith.addi %2, %3 : vector<16x64xi32>
    %5 = vector.broadcast %0 : vector<16x1xi32> to vector<16x64xi32>
    %6 = arith.cmpi eq, %4, %5 : vector<16x64xi32>
    %7 = arith.extui %6 : vector<16x64xi1> to vector<16x64xi32>
    %8 = arith.sitofp %7 : vector<16x64xi32> to vector<16x64xf32>
    %c0_1 = arith.constant 0 : index
    %c0_2 = arith.constant 0 : index
    %9 = vector.load %arg2[%c0_1, %c0_2] : memref<64x128xf32, #tpu.memory_space<vmem>>, vector<64x128xf32>
    %cst_3 = arith.constant dense<0.000000e+00> : vector<16x128xf32>
    %10 = tpu.matmul %8, %9, %cst_3 {dimension_numbers = #tpu.dot_dimension_numbers<[1], [0], [0], [1], [0, 0, 1, 1], [], []>} : vector<16x64xf32>, vector<64x128xf32>, vector<16x128xf32> -> vector<16x128xf32>
    %11 = arith.addf %1, %10 : vector<16x128xf32>
    %cst_4 = arith.constant 11.3137083 : f32
    %12 = vector.broadcast %cst_4 : f32 to vector<16x128xf32>
    %13 = arith.mulf %11, %12 : vector<16x128xf32>
    %c0_5 = arith.constant 0 : index
    %c0_6 = arith.constant 0 : index
    %14 = vector.load %arg3[%c0_5, %c0_6] : memref<16x128xf32, #tpu.memory_space<vmem>>, vector<16x128xf32>
    tpu.vector_store %arg3[%c0_5, %c0_6], %13 {strides = array<i32>} : memref<16x128xf32, #tpu.memory_space<vmem>>, vector<16x128xf32>,
    return
  }
  func.func @transform_0(%arg0: i32) -> (i32, i32) {
    %c0_i32 = arith.constant 0 : i32
    %c0_i32_0 = arith.constant 0 : i32
    return %arg0, %c0_i32 : i32, i32
  }
  func.func @transform_1(%arg0: i32) -> (i32, i32) {
    %c0_i32 = arith.constant 0 : i32
    %c0_i32_0 = arith.constant 0 : i32
    %c0_i32_1 = arith.constant 0 : i32
    return %c0_i32, %c0_i32_0 : i32, i32
  }
  func.func @transform_2(%arg0: i32) -> (i32, i32) {
    %c0_i32 = arith.constant 0 : i32
    %c0_i32_0 = arith.constant 0 : i32
    return %arg0, %c0_i32 : i32, i32
  }
}

</mosaic_0001>

<bundles_post_ra>
// kernel: tpu_custom_call.1
= control target key start
LH: loop header
LB: loop body
LE: loop exit
PB: predicated region body
PF: predicated region fallthrough
CT: control target
= control target key end

     0   :  { %7 = vsyncpa [#allocation3], 0  ;;  %s215_s0 = inlined_call_operand.vmem [shape: s32[16,1], index: 0, kind: input, shape index: {}]   ;;  %s216_s1 = inlined_call_operand.hbm [shape: f32[64,128], index: 1, kind: input, shape index: {}]   ;;  %s217_s2 = inlined_call_operand.hbm [shape: f32[16,128], index: 2, kind: output, shape index: {}]  }
   0x1   :  { %8 = vsyncpa [#allocation4], 0  ;;  %s15_s11 = sshll.u32 %s216_s1, 4  ;;  %s176_s12 = smov [#allocation2]   ;;  %s16_s11 = int_to_ptr.hbm [resolvable:$true] %s15_s11 }
   0x2   :  { %s17_s13 = sshll.u32 %s176_s12, 4  ;;  %s177_s14 = smov 128   ;;  %s18_s13 = int_to_ptr.vmem [resolvable:$true] %s17_s13 }
   0x3   :  { %s178_s15 = smov 8  }
   0x4   :  { %23 = dma.hbm_to_vmem [thread:$0]  %s16_s11, 1024, %s18_s13, [#allocation3], %s177_s14, %s177_s14, %s178_s15  }
   0x5   :  { %172 = dma.done.wait [#allocation3], 1024  }
   0x6   :  { %173 = vsyncadd [#allocation3], 4294966272  ;;  %v179_v0 = vmov 0   ;;  %v28_v1 = vld [vmem:[%s215_s0] sm:$0xff]  ;;  %v51_v2 = vld [vmem:[#allocation2 + $0x38] sm:$0xff]  ;;  %v30_v11 = vlaneseq  ;;  %vm52_vm0 = vcmask 523264  }
   0x7   :  { %123 = vset.pattern.permute.xlu0 %v179_v0  ;;  %67 = vmatpush.msra.mxu0 %v51_v2  ;;  %v50_v3 = vld [vmem:[#allocation2 + $0x30] sm:$0xff]  ;;  %v49_v4 = vld [vmem:[#allocation2 + $0x28] sm:$0xff]  ;;  %v48_v5 = vld [vmem:[#allocation2 + $0x20] sm:$0xff]  ;;  %v180_v14 = vmov 0.0   ;;  %s92_s22 = sshll.u32 %s217_s2, 4  ;;  %s93_s22 = int_to_ptr.hbm [resolvable:$true] %s92_s22 }
   0x8   :  { %33 = vperm.xlu0 %123, %v28_v1   ;;  %109 = vmatpush.msra.mxu1 %v51_v2  ;;  %v29_v6 = vld [vmem:[%s215_s0 + $0x8] sm:$0xff]  ;;  %v47_v7 = vld [vmem:[#allocation2 + $0x18] sm:$0xff]  ;;  %v46_v8 = vld [vmem:[#allocation2 + $0x10] sm:$0xff]  ;;  %v31_v12 = vand.u32 127, %v30_v11  ;;  %s181_s0 = smov [#allocation5]  }
   0x9   :  { %68 = vmatpush.msra.mxu0 %v50_v3  ;;  %v45_v9 = vld [vmem:[#allocation2 + $0x8] sm:$0xff]  ;;  %v44_v10 = vld [vmem:[#allocation2] sm:$0xff]  ;;  %s90_s19 = sshll.u32 %s181_s0, 4  ;;  %s91_s19 = int_to_ptr.vmem [resolvable:$true] %s90_s19 }
   0xa   :  { %110 = vmatpush.msra.mxu1 %v50_v3 }
   0xb   :  { %69 = vmatpush.msra.mxu0 %v49_v4 }
   0xc   :  { %111 = vmatpush.msra.mxu1 %v49_v4 }
   0xd   :  { %70 = vmatpush.msra.mxu0 %v48_v5 }
   0xe   :  { %112 = vmatpush.msra.mxu1 %v48_v5 }
   0xf   :  { %71 = vmatpush.msra.mxu0 %v47_v7 }
  0x10   :  { %36 = vperm.xlu0 %123, %v29_v6   ;;  %113 = vmatpush.msra.mxu1 %v47_v7 }
  0x11   :  { %72 = vmatpush.msra.mxu0 %v46_v8 }
  0x12   :  { %114 = vmatpush.msra.mxu1 %v46_v8 }
  0x13   :  { %73 = vmatpush.msra.mxu0 %v45_v9 }
  0x14   :  { %115 = vmatpush.msra.mxu1 %v45_v9 }
  0x15   :  { %74 = vmatpush.msra.mxu0 %v44_v10 }
  0x16   :  { %116 = vmatpush.msra.mxu1 %v44_v10 }
  0x7a   :  { %v34_v13 = vpop.permute.xlu0 %33 }
  0x7b   :  { %vm38_vm1 = vcmp.eq.s32.totalorder %v31_v12, %v34_v13 }
  0x7c   :  { %v105_v15 = vsel %vm38_vm1, 1.0, %v180_v14 }
  0x7d   :  { %107 = vmatmul.msk.f32.vlgmr.msra.gmra.mxu0 %vm52_vm0, %v105_v15 }
  0x82   :  { %v37_v16 = vpop.permute.xlu0 %36 }
  0x83   :  { %vm39_vm2 = vcmp.eq.s32.totalorder %v31_v12, %v37_v16 }
  0x84   :  { %v106_v17 = vsel %vm39_vm2, 1.0, %v180_v14 }
  0x85   :  { %108 = vmatmul.msk.f32.vlgmr.msra.gmra.mxu1 %vm52_vm0, %v106_v17 }
  0xfa   :  { %v76_v18 = vpop.f32.mrf.mxu0 }
  0xfb   :  { %v82_v19 = vmul.f32 11.313708, %v76_v18 }
  0xfd   :  { %84 = vst [vmem:[#allocation5] sm:$0xff] %v82_v19 }
 0x102   :  { %v79_v20 = vpop.f32.mrf.mxu1 }
 0x103   :  { %v83_v21 = vmul.f32 11.313708, %v79_v20 }
 0x105   :  { %85 = vst [vmem:[#allocation5 + $0x8] sm:$0xff] %v83_v21 }
 0x106   :  { %98 = dma.vmem_to_hbm [thread:$0]  %s91_s19, 256, %s93_s22, [#allocation4], %s177_s14, %s177_s14, %s178_s15  }
 0x107   :  { %174 = dma.done.wait [#allocation4], 256  }
 0x108   :  { %175 = vsyncadd [#allocation4], 4294967040 }
 0x109   :  { %103 = vsyncpa [#allocation3], 1 }
 0x10a   :  { %104 = vsyncpa [#allocation4], 1 }

</bundles_post_ra>
